<compile_context>
chip_gen: v5e
topology: v5e:2x2
jax: 0.10.0
libtpu: 0.0.40
codegen_flags: <defaults>
</compile_context>

<pallas_src>
import functools

import jax
import jax.numpy as jnp
from jax.experimental import pallas as pl
from jax.experimental.pallas import tpu as pltpu


def _gat_kernel(num_heads, out_dim, apply_act, add_residual, int8_gate, precise,
                h_ref, z_ref, ssrc_ref, sdst_ref, slope_ref, gate_ref, o_ref):
    """Row-tiled multi-head GAT attention + aggregation.

    Grid axis 0 = dst-row tile.  Every tile is independent (z / s_src / s_dst are
    precomputed in the wrapper), so the axis is marked "parallel".
    """
    gate = gate_ref[...].astype(jnp.float32)                 # [TM, N]
    g_mul = jnp.maximum(gate, 0.0)                           # multiplicative mask on edges
    if int8_gate:
        g_add = jnp.where(gate < 0.0, -1e30, 0.0)            # additive bias on non-edges
    else:
        g_add = jnp.minimum(gate, 0.0)

    s_dst = sdst_ref[...]                                    # [TM, H] f32

    head_outs = []
    for hd in range(num_heads):                              # static unroll (H small)
        e = s_dst[:, hd:hd + 1] + ssrc_ref[pl.ds(hd, 1), :]  # [TM, N] (dst x src)
        e = jnp.maximum(e, 0.01 * e)                         # leaky_relu (slope 0.01)
        e = e * g_mul + g_add                                # mask + adjacency bias
        m = jnp.max(e, axis=-1, keepdims=True)
        p = jnp.exp(e - m)
        denom = jnp.sum(p, axis=-1, keepdims=True)
        z_h = z_ref[:, hd * out_dim:(hd + 1) * out_dim]      # [N, D]
        if precise:
            alpha = p / denom
            acc = jnp.dot(alpha, z_h.astype(jnp.float32),
                          preferred_element_type=jnp.float32)
        else:
            # bf16 MXU path (f32 accumulate): ~3-4x MXU throughput on v6e/v7x.
            alpha = (p * pl.reciprocal(denom, approx=True)).astype(jnp.bfloat16)
            acc = jnp.dot(alpha, z_h, preferred_element_type=jnp.float32)
        head_outs.append(acc)                                # [TM, D] f32

    h_out = head_outs[0] if num_heads == 1 else jnp.concatenate(head_outs, axis=-1)

    if apply_act:                                            # PReLU iff num_heads != 1
        slope = slope_ref[...]                               # [1, H*D] per-head slopes
        h_out = jnp.where(h_out >= 0, h_out, slope * h_out)
    if add_residual:                                         # fused residual add
        h_out = h_out + h_ref[...]
    o_ref[...] = h_out.astype(o_ref.dtype)                   # lane-dense [TM, H*D]


def precompute_gate(adj_ds, train_mask, fixed_mask, binary_masks=False):
    """Fuse adjacency + masks into a single O(N^2) gate stream.

    bf16 gate: >=0 entries are the multiplicative mask on real edges, -1e30 marks
    non-edges.  int8 gate ({-1,0,1}; masks must be binary) halves the dominant HBM
    stream.  Cache the result across steps if adjacency / masks are static.
    """
    if binary_masks:
        live = (train_mask * fixed_mask) > 0
        return jnp.where(adj_ds > 0, live.astype(jnp.int8), jnp.int8(-1)).astype(jnp.int8)
    return jnp.where(adj_ds > 0, train_mask * fixed_mask, -1e30).astype(jnp.bfloat16)


def _vmem_capacity_bytes():
    try:
        return int(pltpu.get_tpu_info().vmem_capacity_bytes)
    except Exception:
        return 64 * 1024 * 1024                              # conservative (v7x-sized)


def _pick_block_rows(N, HD, in_dim, gate_itemsize, z_itemsize, budget_bytes):
    """Largest row tile whose per-tile VMEM footprint fits the generation's budget."""
    resident = N * HD * z_itemsize + N * 8 * 4 + 8 * HD * 4  # z + s_src + slope (padded)
    fallback = None
    for cand in (1024, 512, 256, 128, 64, 32, 16, 8):
        if N % cand:
            continue
        if gate_itemsize == 1 and cand % 32 and cand != N:   # int8 sublane tile = 32
            continue
        per_tile = 2 * cand * N * gate_itemsize              # gate, double-buffered
        per_tile += 6 * cand * N * 4                         # f32 [TM, N] temporaries
        per_tile += 2 * cand * (in_dim + HD + 8) * 4         # h / out / s_dst buffers
        if resident + per_tile <= budget_bytes:
            return cand
        fallback = cand
    return fallback if fallback is not None else N


def gat_layer_forward(h, adj_ds, train_mask, fixed_mask, params,
                      residual=False, block_rows=None, binary_masks=False,
                      precise=False, gate=None):
    """Pallas GATLayer forward.

    h: [N, in_dim]; adj_ds / train_mask / fixed_mask: [N, N] in [dst, src] layout.
    params: W [H, in, out], a_src/a_dst [H, 1, out], prelu [H, 1, 1].
    precise=True  -> exact softmax divide + f32 MXU (accuracy fallback for deep stacks).
    binary_masks  -> int8 gate encoding (masks must be {0,1}).
    gate          -> optional precomputed gate (see precompute_gate) so the O(N^2)
                     preprocessing is hoisted/cached outside the per-step path.
    """
    W, a_src, a_dst, prelu = (params["W"], params["a_src"],
                              params["a_dst"], params["prelu"])
    H, in_dim, out_dim = W.shape
    N = h.shape[0]
    HD = H * out_dim
    apply_act = (H != 1)
    add_residual = bool(residual) and (in_dim == HD)

    # ---- hoisted whole-graph projections (wide MXU matmuls in plain XLA) ----
    h = h.astype(jnp.float32)
    w_flat = jnp.transpose(W, (1, 0, 2)).reshape(in_dim, HD).astype(jnp.float32)
    z_f32 = h @ w_flat                                       # [N, H*D]
    eye = jnp.eye(H, dtype=jnp.float32)
    a_src_bd = (a_src[:, 0, :, None] * eye[:, None, :]).reshape(HD, H).astype(jnp.float32)
    a_dst_bd = (a_dst[:, 0, :, None] * eye[:, None, :]).reshape(HD, H).astype(jnp.float32)
    s_src_t = (z_f32 @ a_src_bd).T                           # [H, N] per-head src scores
    s_dst = z_f32 @ a_dst_bd                                 # [N, H] per-head dst scores
    z_in = z_f32 if precise else z_f32.astype(jnp.bfloat16)  # bf16 for the alpha@z MXU path
    slope_vec = jnp.repeat(prelu[:, 0, 0], out_dim)[None, :].astype(jnp.float32)  # [1, HD]

    # ---- single O(N^2) gate stream ----
    if gate is None:
        gate = precompute_gate(adj_ds, train_mask, fixed_mask, binary_masks)
    int8_gate = gate.dtype == jnp.int8

    # ---- generation-aware VMEM budget & row tile ----
    vmem_cap = _vmem_capacity_bytes()
    vmem_limit = min(vmem_cap, 128 * 1024 * 1024) * 3 // 4   # ~96 MiB v5e/v6e, ~48 MiB v7x
    if block_rows is None:
        block_rows = _pick_block_rows(N, HD, in_dim, gate.dtype.itemsize,
                                      z_in.dtype.itemsize,
                                      budget_bytes=vmem_limit * 8 // 10)
    assert N % block_rows == 0, "N must be divisible by block_rows"
    num_tiles = N // block_rows

    kernel = functools.partial(_gat_kernel, H, out_dim, apply_act, add_residual,
                               int8_gate, precise)
    out = pl.pallas_call(
        kernel,
        out_shape=jax.ShapeDtypeStruct((N, HD), jnp.float32),
        grid_spec=pltpu.PrefetchScalarGridSpec(
            num_scalar_prefetch=0,
            grid=(num_tiles,),
            in_specs=[
                pl.BlockSpec((block_rows, in_dim), lambda i: (i, 0)),  # h (residual, row-tiled)
                pl.BlockSpec((N, HD), lambda i: (0, 0)),               # z (resident, DMA'd once)
                pl.BlockSpec((H, N), lambda i: (0, 0)),                # per-head src scores
                pl.BlockSpec((block_rows, H), lambda i: (i, 0)),       # per-head dst scores
                pl.BlockSpec((1, HD), lambda i: (0, 0)),               # PReLU slopes
                pl.BlockSpec((block_rows, N), lambda i: (i, 0)),       # fused gate (row-tiled)
            ],
            out_specs=pl.BlockSpec((block_rows, HD), lambda i: (i, 0)),
        ),
        compiler_params=pltpu.CompilerParams(
            # No cross-tile scratch carry anymore: row tiles are independent, so the
            # grid axis is parallel (sharded across TCs on v7x; no-op on v5e/v6e).
            dimension_semantics=("parallel",),
            vmem_limit_bytes=int(vmem_limit),
        ),
    )(h, z_in, s_src_t, s_dst, slope_vec, gate)
    return out


def gat_layer_reference(h, adj_ds, train_mask, fixed_mask, params, residual=False):
    """Pure-JAX reference mirroring the PyTorch/DGL semantics."""
    W, a_src, a_dst, prelu = (params["W"], params["a_src"],
                              params["a_dst"], params["prelu"])
    H, in_dim, out_dim = W.shape
    outs = []
    for hd in range(H):
        z = h @ W[hd]
        s_src = z @ a_src[hd, 0]
        s_dst = z @ a_dst[hd, 0]
        e = s_dst[:, None] + s_src[None, :]
        e = jnp.where(e >= 0, e, 0.01 * e)
        e = e * train_mask * fixed_mask
        e = jnp.where(adj_ds > 0, e, -jnp.inf)
        alpha = jax.nn.softmax(e, axis=-1)
        ho = alpha @ z
        if H != 1:
            ho = jnp.where(ho >= 0, ho, prelu[hd, 0, 0] * ho)
        outs.append(ho)
    h_cat = jnp.concatenate(outs, axis=1)
    if residual and (in_dim == out_dim * H):
        h_cat = h + h_cat
    return h_cat


if __name__ == "__main__":
    N, in_dim, out_dim, num_heads = 64, 32, 16, 2
    residual = True  # in_dim == out_dim * num_heads, so residual path is active

    key = jax.random.PRNGKey(0)
    k_h, k_adj, k_tm, k_fm, k_w, k_a = jax.random.split(key, 6)

    h = jax.random.normal(k_h, (N, in_dim), dtype=jnp.float32)

    # dense adjacency in [dst, src] layout, with self-loops so every node has an in-edge
    adj = (jax.random.uniform(k_adj, (N, N)) < 0.15).astype(jnp.float32)
    adj = jnp.maximum(adj, jnp.eye(N, dtype=jnp.float32))

    train_mask = (jax.random.uniform(k_tm, (N, N)) < 0.8).astype(jnp.float32)
    fixed_mask = (jax.random.uniform(k_fm, (N, N)) < 0.9).astype(jnp.float32)

    # deterministic synthetic parameters (PyTorch fc: [out,in] -> stored here as [in,out])
    W = 0.1 * jax.random.normal(k_w, (num_heads, in_dim, out_dim), dtype=jnp.float32)
    attn_w = 0.1 * jax.random.normal(k_a, (num_heads, 1, 2 * out_dim), dtype=jnp.float32)
    a_src = attn_w[:, :, :out_dim]                 # [H, 1, out_dim]
    a_dst = attn_w[:, :, out_dim:]                 # [H, 1, out_dim]
    prelu = jnp.full((num_heads, 1, 1), 0.25, dtype=jnp.float32)  # nn.PReLU() default init

    params = {"W": W, "a_src": a_src, "a_dst": a_dst, "prelu": prelu}

    ref = gat_layer_reference(h, adj, train_mask, fixed_mask, params, residual=residual)

    # Fast path: bf16 gate + bf16 MXU + approx softmax reciprocal.  block_rows=32
    # exercises the row-tiled parallel grid (2 steps) at this toy size.
    out_fast = gat_layer_forward(h, adj, train_mask, fixed_mask, params,
                                 residual=residual, block_rows=32)
    out_fast = jax.block_until_ready(out_fast)
    assert out_fast.shape == (N, num_heads * out_dim)
    # bf16 alpha/z on the MXU + approx reciprocal -> ~1e-3-level relative error budget
    assert jnp.allclose(out_fast, ref, rtol=2e-2, atol=1e-2), \
        float(jnp.max(jnp.abs(out_fast - ref)))

    # Precise fallback + int8 gate encoding (demo masks are binary): exact divide +
    # f32 MXU accumulate -> tight tolerance; also exercises the int8 gate decode path.
    out_precise = gat_layer_forward(h, adj, train_mask, fixed_mask, params,
                                    residual=residual, block_rows=32,
                                    binary_masks=True, precise=True)
    out_precise = jax.block_until_ready(out_precise)
    assert jnp.allclose(out_precise, ref, rtol=1e-3, atol=1e-3), \
        float(jnp.max(jnp.abs(out_precise - ref)))

    print("KERNEL_OK")
</pallas_src>

<mosaic_0001>
module attributes {stable_mosaic.version = 11 : i64} {
  func.func @_gat_kernel(%arg0: i32, %arg1: memref<32x32xf32, #tpu.memory_space<vmem>>, %arg2: memref<64x32xbf16, #tpu.memory_space<vmem>>, %arg3: memref<2x64xf32, #tpu.memory_space<vmem>>, %arg4: memref<32x2xf32, #tpu.memory_space<vmem>>, %arg5: memref<1x32xf32, #tpu.memory_space<vmem>>, %arg6: memref<32x64xbf16, #tpu.memory_space<vmem>>, %arg7: memref<32x32xf32, #tpu.memory_space<vmem>>) attributes {dimension_semantics = [#tpu.dimension_semantics<parallel>], iteration_bounds = array<i64: 2>, scalar_prefetch = 0 : i64, scratch_operands = 0 : i64, tpu.core_type = #tpu.core_type<tc>, window_params = [{transform_indices = @transform_0, window_bounds = array<i64: 32, 32>}, {pipeline_mode = #tpu.pipeline_mode<synchronous>, transform_indices = @transform_1, window_bounds = array<i64: 64, 32>}, {pipeline_mode = #tpu.pipeline_mode<synchronous>, transform_indices = @transform_2, window_bounds = array<i64: 2, 64>}, {transform_indices = @transform_3, window_bounds = array<i64: 32, 2>}, {pipeline_mode = #tpu.pipeline_mode<synchronous>, transform_indices = @transform_4, window_bounds = array<i64: 1, 32>}, {transform_indices = @transform_5, window_bounds = array<i64: 32, 64>}, {transform_indices = @transform_6, window_bounds = array<i64: 32, 32>}]} {
    %c0 = arith.constant 0 : index
    %c0_0 = arith.constant 0 : index
    %0 = vector.load %arg6[%c0, %c0_0] : memref<32x64xbf16, #tpu.memory_space<vmem>>, vector<32x64xbf16>
    %1 = arith.extf %0 : vector<32x64xbf16> to vector<32x64xf32>
    %cst = arith.constant 0.000000e+00 : f32
    %2 = vector.broadcast %cst : f32 to vector<32x64xf32>
    %3 = arith.maximumf %1, %2 : vector<32x64xf32>
    %cst_1 = arith.constant 0.000000e+00 : f32
    %4 = vector.broadcast %cst_1 : f32 to vector<32x64xf32>
    %5 = arith.minimumf %1, %4 : vector<32x64xf32>
    %c0_2 = arith.constant 0 : index
    %c0_3 = arith.constant 0 : index
    %6 = vector.load %arg4[%c0_2, %c0_3] : memref<32x2xf32, #tpu.memory_space<vmem>>, vector<32x2xf32>
    %7 = vector.extract_strided_slice %6 {offsets = [0, 0], sizes = [32, 1], strides = [1, 1]} : vector<32x2xf32> to vector<32x1xf32>
    %c0_4 = arith.constant 0 : index
    %c0_5 = arith.constant 0 : index
    %8 = vector.load %arg3[%c0_4, %c0_5] : memref<2x64xf32, #tpu.memory_space<vmem>>, vector<1x64xf32>
    %9 = vector.broadcast %7 : vector<32x1xf32> to vector<32x64xf32>
    %10 = vector.broadcast %8 : vector<1x64xf32> to vector<32x64xf32>
    %11 = arith.addf %9, %10 : vector<32x64xf32>
    %cst_6 = arith.constant 0.00999999977 : f32
    %12 = vector.broadcast %cst_6 : f32 to vector<32x64xf32>
    %13 = arith.mulf %12, %11 : vector<32x64xf32>
    %14 = arith.maximumf %11, %13 : vector<32x64xf32>
    %15 = arith.mulf %14, %3 : vector<32x64xf32>
    %16 = arith.addf %15, %5 : vector<32x64xf32>
    %cst_7 = arith.constant dense<0xFF800000> : vector<32xf32>
    %17 = vector.multi_reduction <maximumf>, %16, %cst_7 [1] : vector<32x64xf32> to vector<32xf32>
    %18 = vector.shape_cast %17 : vector<32xf32> to vector<32x1xf32>
    %19 = vector.broadcast %18 : vector<32x1xf32> to vector<32x64xf32>
    %20 = arith.subf %16, %19 : vector<32x64xf32>
    %21 = math.exp %20 : vector<32x64xf32>
    %cst_8 = arith.constant dense<0.000000e+00> : vector<32xf32>
    %22 = vector.multi_reduction <add>, %21, %cst_8 [1] : vector<32x64xf32> to vector<32xf32>
    %23 = vector.shape_cast %22 : vector<32xf32> to vector<32x1xf32>
    %c0_9 = arith.constant 0 : index
    %c0_10 = arith.constant 0 : index
    %24 = vector.load %arg2[%c0_9, %c0_10] : memref<64x32xbf16, #tpu.memory_space<vmem>>, vector<64x16xbf16>
    %25 = tpu.reciprocal %23 {approx = true} : vector<32x1xf32> -> vector<32x1xf32>
    %26 = vector.broadcast %25 : vector<32x1xf32> to vector<32x64xf32>
    %27 = arith.mulf %21, %26 : vector<32x64xf32>
    %28 = arith.truncf %27 : vector<32x64xf32> to vector<32x64xbf16>
    %cst_11 = arith.constant dense<0.000000e+00> : vector<32x16xf32>
    %29 = tpu.matmul %28, %24, %cst_11 {dimension_numbers = #tpu.dot_dimension_numbers<[1], [0], [0], [1], [0, 0, 1, 1], [], []>} : vector<32x64xbf16>, vector<64x16xbf16>, vector<32x16xf32> -> vector<32x16xf32>
    %30 = vector.extract_strided_slice %6 {offsets = [0, 1], sizes = [32, 1], strides = [1, 1]} : vector<32x2xf32> to vector<32x1xf32>
    %c1 = arith.constant 1 : index
    %c0_12 = arith.constant 0 : index
    %31 = vector.load %arg3[%c1, %c0_12] : memref<2x64xf32, #tpu.memory_space<vmem>>, vector<1x64xf32>
    %32 = vector.broadcast %30 : vector<32x1xf32> to vector<32x64xf32>
    %33 = vector.broadcast %31 : vector<1x64xf32> to vector<32x64xf32>
    %34 = arith.addf %32, %33 : vector<32x64xf32>
    %cst_13 = arith.constant 0.00999999977 : f32
    %35 = vector.broadcast %cst_13 : f32 to vector<32x64xf32>
    %36 = arith.mulf %35, %34 : vector<32x64xf32>
    %37 = arith.maximumf %34, %36 : vector<32x64xf32>
    %38 = arith.mulf %37, %3 : vector<32x64xf32>
    %39 = arith.addf %38, %5 : vector<32x64xf32>
    %cst_14 = arith.constant dense<0xFF800000> : vector<32xf32>
    %40 = vector.multi_reduction <maximumf>, %39, %cst_14 [1] : vector<32x64xf32> to vector<32xf32>
    %41 = vector.shape_cast %40 : vector<32xf32> to vector<32x1xf32>
    %42 = vector.broadcast %41 : vector<32x1xf32> to vector<32x64xf32>
    %43 = arith.subf %39, %42 : vector<32x64xf32>
    %44 = math.exp %43 : vector<32x64xf32>
    %cst_15 = arith.constant dense<0.000000e+00> : vector<32xf32>
    %45 = vector.multi_reduction <add>, %44, %cst_15 [1] : vector<32x64xf32> to vector<32xf32>
    %46 = vector.shape_cast %45 : vector<32xf32> to vector<32x1xf32>
    %c0_16 = arith.constant 0 : index
    %c16 = arith.constant 16 : index
    %47 = vector.load %arg2[%c0_16, %c16] : memref<64x32xbf16, #tpu.memory_space<vmem>>, vector<64x16xbf16>
    %48 = tpu.reciprocal %46 {approx = true} : vector<32x1xf32> -> vector<32x1xf32>
    %49 = vector.broadcast %48 : vector<32x1xf32> to vector<32x64xf32>
    %50 = arith.mulf %44, %49 : vector<32x64xf32>
    %51 = arith.truncf %50 : vector<32x64xf32> to vector<32x64xbf16>
    %cst_17 = arith.constant dense<0.000000e+00> : vector<32x16xf32>
    %52 = tpu.matmul %51, %47, %cst_17 {dimension_numbers = #tpu.dot_dimension_numbers<[1], [0], [0], [1], [0, 0, 1, 1], [], []>} : vector<32x64xbf16>, vector<64x16xbf16>, vector<32x16xf32> -> vector<32x16xf32>
    %53 = tpu.concatenate %29, %52 in 1 : vector<32x16xf32>, vector<32x16xf32> -> vector<32x32xf32>
    %c0_18 = arith.constant 0 : index
    %c0_19 = arith.constant 0 : index
    %54 = vector.load %arg5[%c0_18, %c0_19] : memref<1x32xf32, #tpu.memory_space<vmem>>, vector<1x32xf32>
    %cst_20 = arith.constant 0.000000e+00 : f32
    %55 = vector.broadcast %cst_20 : f32 to vector<32x32xf32>
    %56 = arith.cmpf oge, %53, %55 : vector<32x32xf32>
    %57 = vector.broadcast %54 : vector<1x32xf32> to vector<32x32xf32>
    %58 = arith.mulf %57, %53 : vector<32x32xf32>
    %59 = arith.select %56, %53, %58 : vector<32x32xi1>, vector<32x32xf32>
    %c0_21 = arith.constant 0 : index
    %c0_22 = arith.constant 0 : index
    %60 = vector.load %arg1[%c0_21, %c0_22] : memref<32x32xf32, #tpu.memory_space<vmem>>, vector<32x32xf32>
    %61 = arith.addf %59, %60 : vector<32x32xf32>
    %c0_23 = arith.constant 0 : index
    %c0_24 = arith.constant 0 : index
    %62 = vector.load %arg7[%c0_23, %c0_24] : memref<32x32xf32, #tpu.memory_space<vmem>>, vector<32x32xf32>
    tpu.vector_store %arg7[%c0_23, %c0_24], %61 {strides = array<i32>} : memref<32x32xf32, #tpu.memory_space<vmem>>, vector<32x32xf32>,
    return
  }
  func.func @transform_0(%arg0: i32) -> (i32, i32) {
    %c0_i32 = arith.constant 0 : i32
    %c0_i32_0 = arith.constant 0 : i32
    return %arg0, %c0_i32 : i32, i32
  }
  func.func @transform_1(%arg0: i32) -> (i32, i32) {
    %c0_i32 = arith.constant 0 : i32
    %c0_i32_0 = arith.constant 0 : i32
    %c0_i32_1 = arith.constant 0 : i32
    return %c0_i32, %c0_i32_0 : i32, i32
  }
  func.func @transform_2(%arg0: i32) -> (i32, i32) {
    %c0_i32 = arith.constant 0 : i32
    %c0_i32_0 = arith.constant 0 : i32
    %c0_i32_1 = arith.constant 0 : i32
    return %c0_i32, %c0_i32_0 : i32, i32
  }
  func.func @transform_3(%arg0: i32) -> (i32, i32) {
    %c0_i32 = arith.constant 0 : i32
    %c0_i32_0 = arith.constant 0 : i32
    return %arg0, %c0_i32 : i32, i32
  }
  func.func @transform_4(%arg0: i32) -> (i32, i32) {
    %c0_i32 = arith.constant 0 : i32
    %c0_i32_0 = arith.constant 0 : i32
    %c0_i32_1 = arith.constant 0 : i32
    return %c0_i32, %c0_i32_0 : i32, i32
  }
  func.func @transform_5(%arg0: i32) -> (i32, i32) {
    %c0_i32 = arith.constant 0 : i32
    %c0_i32_0 = arith.constant 0 : i32
    return %arg0, %c0_i32 : i32, i32
  }
  func.func @transform_6(%arg0: i32) -> (i32, i32) {
    %c0_i32 = arith.constant 0 : i32
    %c0_i32_0 = arith.constant 0 : i32
    return %arg0, %c0_i32 : i32, i32
  }
}

</mosaic_0001>

<bundles_post_ra>
// kernel: tpu_custom_call.1
= control target key start
LH: loop header
LB: loop body
LE: loop exit
PB: predicated region body
PF: predicated region fallthrough
CT: control target
= control target key end

     0   :  { %s873_s21 = smov 0   ;;  %s999_s0 = inlined_call_operand.vmem [shape: f32[64,32], index: 0, kind: input, shape index: {}]   ;;  %s1000_s1 = inlined_call_operand.vmem [shape: bf16[64,32], index: 1, kind: input, shape index: {}]   ;;  %s1001_s2 = inlined_call_operand.vmem [shape: f32[2,64], index: 2, kind: input, shape index: {}]   ;;  %s1002_s3 = inlined_call_operand.vmem [shape: f32[64,2], index: 3, kind: input, shape index: {}]   ;;  %s1003_s4 = inlined_call_operand.vmem [shape: f32[1,32], index: 4, kind: input, shape index: {}]   ;;  %s1004_s5 = inlined_call_operand.vmem [shape: bf16[64,64], index: 5, kind: input, shape index: {}]   ;;  %s1005_s6 = inlined_call_operand.vmem [shape: f32[64,32], index: 6, kind: output, shape index: {}]  }
   0x1 LB: > { %s717_s22 = sadd.s32 4294967295, %s832_s21   ;;  %p721_p0 = scmp.ge.s32.totalorder %s832_s21, 1  ;;  %s832_s21 = sphi %s873_s21, %s16_s21  }
   0x2   : > { %p235_p1 = scmp.lt.s32.totalorder %s832_s21, 3 }
   0x4   : > { %p236_p2 = pnand %p721_p0, %p235_p1 }
   0x5   : > { %s722_s23 = sshll.u32 (!%p236_p2), %s717_s22, 2  ;;  %s836_s14 = smov (!%p236_p2), 112  }
   0x6   : > { %239 = sbr.rel (%p236_p2) target bundleno = 688 (0x2b0), region = 44  ;;  %p276_p3 = scmp.lt.s32.totalorder (!%p236_p2), %s722_s23, 7 }
   0x7   : > { %s837_s22 = smov (!%p236_p2), 16  }
   0xb   : > { %v834_v0 = vmov 1   ;;  %v835_v1 = vmov 0   ;;  %s1007_s23 = smov (!%p276_p3, %s722_s23), 7  ;;  %v791_v8 = vld [vmem:[%s1001_s2 + $0x1] ss:$0 sm:$0xff]  ;;  %v899_v22 = vld [vmem:[%s1000_s1 + $0x18] sm:$0xff] }
   0xc   : > { %786 = vset.pattern.permute.xlu1 %v834_v0  ;;  %785 = vset.pattern.permute.xlu0 %v834_v0  ;;  %s881_s24 = sshll.u32 %s1007_s23, 3  ;;  %s727_s28 = sshll.u32 %s1007_s23, 2  ;;  %v792_v13 = vld [vmem:[%s1001_s2] ss:$0 sm:$0xff]  ;;  %vm362_vm0 = vcmask 523264   ;;  %vm603_vm1 = vcmask 130048  }
   0xd   : > { %787 = vset.pattern.permute.xlu2 %v835_v1  ;;  %s285_s27 = scalar_lea.vmem %s1002_s3, %s881_s24  ;;  %s291_s7 = scalar_lea.vmem %s1004_s5, %s727_s28  ;;  %765 = vmatpush.bf16.msra.mxu2 %v899_v22  ;;  %vm632_vm3 = vcmask 261120  }
   0xe   : > { %v318_v2 = vld [vmem:[%s285_s27 + $0x10] sm:$0xff]  ;;  %v316_v3 = vld [vmem:[%s285_s27] sm:$0xff]  ;;  %v319_v4 = vld [vmem:[%s285_s27 + $0x18] sm:$0xff]  ;;  %451 = vmatpush.bf16.msra.mxu0 %v899_v22  ;;  %s972_s28 = scalar_lea.vmem %s999_s0, %s881_s24 }
   0xf   : > { %476 = vperm.xlu0 %785, %v318_v2   ;;  %468 = vperm.xlu1 %786, %v316_v3   ;;  %v317_v5 = vld [vmem:[%s285_s27 + $0x8] sm:$0xff]  ;;  %v757_v7 = vld [vmem:[%s291_s7] sm:$0xff]  }
  0x10   : > { %333 = vperm.xlu2 %787, %v318_v2   ;;  %v764_v6 = vld [vmem:[%s291_s7 + $0x8] sm:$0xff]   ;;  %v758_v10 = vunpack.c.l.bf16 %v757_v7  ;;  %v759_v28 = vunpack.c.h.bf16 %v757_v7  ;;  %s980_s7 = scalar_lea.vmem %s1005_s6, %s881_s24 }
  0x11   : > { %v762_v9 = vunpack.c.l.bf16 %v764_v6  ;;  %v763_v27 = vunpack.c.h.bf16 %v764_v6 }
  0x12   : > { %v308_v20 = vmax.f32 %v758_v10, 0.0  ;;  %v312_v26 = vmin.f32 %v758_v10, 0.0  ;;  %v309_v39 = vmax.f32 %v759_v28, 0.0  ;;  %v313_v48 = vmin.f32 %v759_v28, 0.0  ;;  %v752_v28 = vld [vmem:[%s1000_s1] sm:$0xff] }
  0x13   : > { %v310_v19 = vmax.f32 %v762_v9, 0.0  ;;  %v314_v25 = vmin.f32 %v762_v9, 0.0  ;;  %v311_v38 = vmax.f32 %v763_v27, 0.0  ;;  %v315_v44 = vmin.f32 %v763_v27, 0.0 }
  0x17   : > { %480 = vperm.xlu0 %785, %v319_v4   ;;  %472 = vperm.xlu1 %786, %v317_v5  }
  0x18   : > { %338 = vperm.xlu2 %787, %v319_v4  }
  0x1f   : > { %789 = vset.pattern.permute.xlu1 %v835_v1  ;;  %788 = vset.pattern.permute.xlu0 %v835_v1 }
  0x20   : > { %328 = vperm.xlu1 %789, %v317_v5   ;;  %323 = vperm.xlu0 %788, %v316_v3  }
  0x28   : > { %790 = vset.pattern.permute.xlu0 %v834_v0 }
  0x6a   : > { %v334_v16 = vpop.permute.xlu2 %333 }
  0x6b   : > { %v344_v21 = vadd.f32 %v792_v13, %v334_v16 }
  0x6d   : > { %v348_v33 = vmul.f32 0.01, %v344_v21 }
  0x6f   : > { %v352_v47 = vmax.f32 %v344_v21, %v348_v33 }
  0x71   : > { %v356_v58 = vmul.f32 %v352_v47, %v310_v19 }
  0x72   : > { %v339_v49 = vpop.permute.xlu2 %338 }
  0x73   : > { %v345_v50 = vadd.f32 %v792_v13, %v339_v49  ;;  %v360_v3 = vadd.f32 %v356_v58, %v314_v25 }
  0x75   : > { %v349_v53 = vmul.f32 0.01, %v345_v50 }
  0x77   : > { %v353_v61 = vmax.f32 %v345_v50, %v349_v53 }
  0x79   : > { %v357_v2 = vmul.f32 %v353_v61, %v311_v38 }
  0x7b   : > { %v913_v6 = vadd.f32 %v357_v2, %v315_v44 }
  0x81   : > { %v477_v11 = vpop.permute.xlu0 %476  ;;  %v469_v12 = vpop.permute.xlu1 %468 }
  0x82   : > { %v486_v14 = vadd.f32 %v791_v8, %v477_v11  ;;  %v484_v15 = vadd.f32 %v791_v8, %v469_v12 }
  0x84   : > { %v490_v17 = vmul.f32 0.01, %v486_v14  ;;  %v488_v18 = vmul.f32 0.01, %v484_v15 }
  0x86   : > { %v494_v23 = vmax.f32 %v486_v14, %v490_v17  ;;  %v492_v24 = vmax.f32 %v484_v15, %v488_v18  ;;  %v372_v14 = vsel %vm362_vm0, %v913_v6, -inf  ;;  %v753_v15 = vld [vmem:[%s1000_s1 + $0x8] sm:$0xff] }
  0x88   : > { %v498_v29 = vmul.f32 %v494_v23, %v310_v19  ;;  %v496_v30 = vmul.f32 %v492_v24, %v308_v20  ;;  %v754_v19 = vld [vmem:[%s1000_s1 + $0x10] sm:$0xff] }
  0x89   : > { %v481_v31 = vpop.permute.xlu0 %480  ;;  %v473_v32 = vpop.permute.xlu1 %472  ;;  %766 = vmatpush.bf16.msra.mxu2 %v754_v19  ;;  %452 = vmatpush.bf16.msra.mxu0 %v754_v19 }
  0x8a   : > { %v487_v34 = vadd.f32 %v791_v8, %v481_v31  ;;  %v485_v35 = vadd.f32 %v791_v8, %v473_v32  ;;  %v502_v36 = vadd.f32 %v498_v29, %v314_v25  ;;  %v903_v37 = vadd.f32 %v496_v30, %v312_v26 }
  0x8b   : > { %v369_v8 = vsel %vm362_vm0, %v360_v3, -inf }
  0x8c   : > { %v491_v40 = vmul.f32 0.01, %v487_v34  ;;  %v489_v41 = vmul.f32 0.01, %v485_v35  ;;  %v510_v42 = vsel %vm362_vm0, %v502_v36, -inf  ;;  %v504_v43 = vsel %vm362_vm0, %v903_v37, -inf }
  0x8d   : > { %511 = vmax.xlane.f32.xlu2 %v510_v42  ;;  %505 = vmax.xlane.f32.xlu0 %v504_v43 }
  0x8e   : > { %v495_v45 = vmax.f32 %v487_v34, %v491_v40  ;;  %v493_v46 = vmax.f32 %v485_v35, %v489_v41  ;;  %767 = vmatpush.bf16.msra.mxu2 %v753_v15  ;;  %453 = vmatpush.bf16.msra.mxu0 %v753_v15 }
  0x90   : > { %v499_v51 = vmul.f32 %v495_v45, %v311_v38  ;;  %v497_v52 = vmul.f32 %v493_v46, %v309_v39 }
  0x92   : > { %v329_v54 = vpop.permute.xlu1 %328  ;;  %v503_v55 = vadd.f32 %v499_v51, %v315_v44  ;;  %v908_v56 = vadd.f32 %v497_v52, %v313_v48  ;;  %v324_v57 = vpop.permute.xlu0 %323  ;;  %768 = vmatpush.bf16.msra.mxu2 %v752_v28  ;;  %454 = vmatpush.bf16.msra.mxu0 %v752_v28 }
  0x93   : > { %v343_v59 = vadd.f32 %v792_v13, %v329_v54  ;;  %v342_v60 = vadd.f32 %v792_v13, %v324_v57 }
  0x94   : > { %v513_v62 = vsel %vm362_vm0, %v503_v55, -inf  ;;  %v507_v63 = vsel %vm362_vm0, %v908_v56, -inf }
  0x95   : > { %v347_v0 = vmul.f32 0.01, %v343_v59  ;;  %514 = vmax.xlane.f32.xlu1 %v513_v62  ;;  %508 = vmax.xlane.f32.xlu2 %v507_v63  ;;  %v346_v1 = vmul.f32 0.01, %v342_v60 }
  0x97   : > { %v351_v4 = vmax.f32 %v343_v59, %v347_v0  ;;  %v350_v5 = vmax.f32 %v342_v60, %v346_v1 }
  0x99   : > { %v355_v7 = vmul.f32 %v351_v4, %v309_v39  ;;  %v354_v9 = vmul.f32 %v350_v5, %v308_v20 }
  0x9b   : > { %v359_v10 = vadd.f32 %v355_v7, %v313_v48  ;;  %v917_v12 = vadd.f32 %v354_v9, %v312_v26 }
  0x9d   : > { %370 = vmax.xlane.f32.xlu2 %v369_v8  ;;  %v366_v11 = vsel %vm362_vm0, %v359_v10, -inf  ;;  %v363_v13 = vsel %vm362_vm0, %v917_v12, -inf }
  0x9e   : > { %367 = vmax.xlane.f32.xlu0 %v366_v11 }
  0xa5   : > { %364 = vmax.xlane.f32.xlu2 %v363_v13 }
  0xae   : > { %556 = vrot.lane.b32.xlu1 %v899_v22, %s836_s14 }
  0xd8   : > { %373 = vmax.xlane.f32.xlu1 %v372_v14 }
  0xf1   : > { %552 = vrot.lane.b32.xlu1 %v753_v15, %s836_s14 }
 0x100   : > { %v512_v16 = vpop.xlane.xlu2 %511  ;;  %v506_v22 = vpop.xlane.xlu0 %505 }
 0x101   : > { %v518_v17 = vsub.f32 %v502_v36, %v512_v16  ;;  %v516_v26 = vsub.f32 %v903_v37, %v506_v22 }
 0x103   : > { %v524_v18 = vmul.f32 1.442695, %v518_v17  ;;  %v520_v29 = vmul.f32 1.442695, %v516_v26 }
 0x105   : > { %794 = vpow2.f32 %v524_v18 }
 0x108   : > { %v509_v20 = vpop.xlane.xlu2 %508  ;;  %v515_v21 = vpop.xlane.xlu1 %514 }
 0x109   : > { %v519_v23 = vsub.f32 %v503_v55, %v515_v21  ;;  %v517_v36 = vsub.f32 %v908_v56, %v509_v20 }
 0x10b   : > { %v932_v24 = vpop.eup %794  ;;  %v526_v25 = vmul.f32 1.442695, %v519_v23  ;;  %v522_v39 = vmul.f32 1.442695, %v517_v36 }
 0x10c   : > { %v534_v27 = vsel %vm362_vm0, %v932_v24, 0.0 }
 0x10d   : > { %535 = vadd.xlane.f32.xlu2 %v534_v27  ;;  %796 = vpow2.f32 %v526_v25 }
 0x10e   : > { %798 = vpow2.f32 %v520_v29 }
 0x110   : > { %v371_v30 = vpop.xlane.xlu2 %370 }
 0x111   : > { %v377_v31 = vsub.f32 %v360_v3, %v371_v30  ;;  %v368_v32 = vpop.xlane.xlu0 %367  ;;  %v793_v30 = vld [vmem:[%s1003_s4] ss:$0 sm:$0xff] }
 0x112   : > { %v376_v34 = vsub.f32 %v359_v10, %v368_v32 }
 0x113   : > { %v383_v33 = vmul.f32 1.442695, %v377_v31  ;;  %v797_v35 = vpop.eup %796 }
 0x114   : > { %v537_v37 = vsel %vm362_vm0, %v797_v35, 0.0  ;;  %v381_v38 = vmul.f32 1.442695, %v376_v34  ;;  %v799_v40 = vpop.eup %798 }
 0x115   : > { %800 = vpow2.f32 %v383_v33  ;;  %538 = vadd.xlane.f32.xlu0 %v537_v37  ;;  %v528_v43 = vsel %vm362_vm0, %v799_v40, 0.0 }
 0x116   : > { %802 = vpow2.f32 %v381_v38 }
 0x117   : > { %804 = vpow2.f32 %v522_v39 }
 0x118   : > { %v365_v52 = vpop.xlane.xlu2 %364 }
 0x119   : > { %v375_v53 = vsub.f32 %v917_v12, %v365_v52  ;;  %v626_v52 = vld [vmem:[%s972_s28 + $0x10] sm:$0xff] }
 0x11b   : > { %v942_v41 = vpop.eup %800  ;;  %v379_v55 = vmul.f32 1.442695, %v375_v53 }
 0x11c   : > { %v393_v42 = vsel %vm362_vm0, %v942_v41, 0.0  ;;  %v947_v45 = vpop.eup %802 }
 0x11d   : > { %394 = vadd.xlane.f32.xlu1 %v393_v42  ;;  %529 = vadd.xlane.f32.xlu0 %v528_v43  ;;  %v805_v46 = vpop.eup %804  ;;  %v390_v47 = vsel %vm362_vm0, %v947_v45, 0.0 }
 0x11e   : > { %v531_v48 = vsel %vm362_vm0, %v805_v46, 0.0 }
 0x120   : > { %v557_v44 = vpop.permute.xlu1 %556 }
 0x121   : > { %572 = vmatpush.bf16.msra.mxu1 %v557_v44  ;;  %769 = vmatpush.bf16.msra.mxu3 %v557_v44 }
 0x125   : > { %391 = vadd.xlane.f32.xlu1 %v390_v47  ;;  %554 = vrot.lane.b32.xlu2 %v754_v19, %s836_s14 }
 0x126   : > { %532 = vadd.xlane.f32.xlu0 %v531_v48 }
 0x13a   : > { %550 = vrot.lane.b32.xlu0 %v752_v28, %s836_s14 }
 0x14b   : > { %v374_v49 = vpop.xlane.xlu1 %373 }
 0x14c   : > { %v378_v50 = vsub.f32 %v913_v6, %v374_v49 }
 0x14e   : > { %v385_v51 = vmul.f32 1.442695, %v378_v50  ;;  %v625_v50 = vld [vmem:[%s972_s28 + $0x8] sm:$0xff] }
 0x150   : > { %806 = vpow2.f32 %v385_v51 }
 0x151   : > { %808 = vpow2.f32 %v379_v55 }
 0x156   : > { %v807_v54 = vpop.eup %806 }
 0x157   : > { %v396_v56 = vsel %vm362_vm0, %v807_v54, 0.0  ;;  %v809_v57 = vpop.eup %808 }
 0x158   : > { %397 = vadd.xlane.f32.xlu2 %v396_v56  ;;  %v387_v58 = vsel %vm362_vm0, %v809_v57, 0.0 }
 0x163   : > { %v553_v62 = vpop.permute.xlu1 %552 }
 0x164   : > { %388 = vadd.xlane.f32.xlu0 %v387_v58 }
 0x180   : > { %v536_v59 = vpop.xlane.xlu2 %535 }
 0x188   : > { %v555_v60 = vpop.permute.xlu2 %554  ;;  %v539_v61 = vpop.xlane.xlu0 %538 }
 0x189   : > { %573 = vmatpush.bf16.msra.mxu1 %v555_v60  ;;  %770 = vmatpush.bf16.msra.mxu3 %v555_v60  ;;  %810 = vrcp.f32 %v539_v61 }
 0x18d   : > { %574 = vmatpush.bf16.msra.mxu1 %v553_v62  ;;  %771 = vmatpush.bf16.msra.mxu3 %v553_v62 }
 0x18f   : > { %v811_v1 = vpop.eup %810 }
 0x190   : > { %v530_v63 = vpop.xlane.xlu0 %529  ;;  %v547_v6 = vmul.f32 %v811_v1, %v797_v35  ;;  %v395_v12 = vpop.xlane.xlu1 %394  ;;  %v624_v35 = vld [vmem:[%s972_s28] sm:$0xff] }
 0x198   : > { %v392_v16 = vpop.xlane.xlu1 %391 }
 0x199   : > { %v533_v0 = vpop.xlane.xlu0 %532 }
 0x19a   : > { %812 = vrcp.f32 %v533_v0 }
 0x19b   : > { %814 = vrcp.f32 %v536_v59 }
 0x19c   : > { %816 = vrcp.f32 %v530_v63 }
 0x19d   : > { %818 = vrcp.f32 %v395_v12 }
 0x1a0   : > { %v813_v2 = vpop.eup %812 }
 0x1a1   : > { %v815_v3 = vpop.eup %814  ;;  %v545_v5 = vmul.f32 %v813_v2, %v805_v46 }
 0x1a2   : > { %v817_v4 = vpop.eup %816  ;;  %v546_v9 = vmul.f32 %v815_v3, %v932_v24 }
 0x1a3   : > { %v544_v8 = vmul.f32 %v817_v4, %v799_v40  ;;  %v819_v14 = vpop.eup %818 }
 0x1a4   : > { %v549_v11 = vpack.c.bf16 %v547_v6, %v546_v9  ;;  %v413_v17 = vmul.f32 %v819_v14, %v942_v41 }
 0x1a5   : > { %v548_v10 = vpack.c.bf16 %v545_v5, %v544_v8 }
 0x1ac   : > { %v551_v7 = vpop.permute.xlu0 %550 }
 0x1ad   : > { %575 = vmatpush.bf16.msra.mxu1 %v551_v7  ;;  %772 = vmatpush.bf16.msra.mxu3 %v551_v7 }
 0x1b0   : > { %748 = vmatmul.msk.bf16.vlgmr.msra.gmra.mxu1 %vm362_vm0, %v548_v10  ;;  %749 = vmatmul.msk.bf16.vlgmr.msra.gmra.mxu3 %vm362_vm0, %v549_v11 }
 0x1cb   : > { %v398_v13 = vpop.xlane.xlu2 %397 }
 0x1cc   : > { %820 = vrcp.f32 %v398_v13 }
 0x1cd   : > { %822 = vrcp.f32 %v392_v16 }
 0x1d2   : > { %v821_v15 = vpop.eup %820 }
 0x1d3   : > { %v414_v18 = vmul.f32 %v821_v15, %v807_v54  ;;  %v823_v21 = vpop.eup %822  ;;  %v627_v54 = vld [vmem:[%s972_s28 + $0x18] sm:$0xff] }
 0x1d4   : > { %v412_v24 = vmul.f32 %v823_v21, %v947_v45 }
 0x1d5   : > { %v416_v19 = vpack.c.bf16 %v414_v18, %v413_v17 }
 0x1d7   : > { %v389_v20 = vpop.xlane.xlu0 %388  ;;  %747 = vmatmul.msk.bf16.vlgmr.msra.gmra.mxu2 %vm362_vm0, %v416_v19 }
 0x1d8   : > { %824 = vrcp.f32 %v389_v20 }
 0x1de   : > { %v825_v22 = vpop.eup %824 }
 0x1df   : > { %v411_v23 = vmul.f32 %v825_v22, %v809_v57 }
 0x1e1   : > { %v415_v25 = vpack.c.bf16 %v412_v24, %v411_v23 }
 0x1e3   : > { %746 = vmatmul.msk.bf16.vlgmr.msra.gmra.mxu0 %vm362_vm0, %v415_v25 }
 0x22d   : > { %v577_v26 = vpop.f32.mrf.mxu1 }
 0x22e   : > { %591 = vrot.lane.b32.xlu2 %v577_v26, %s837_s22 }
 0x233   : > { %v582_v27 = vpop.f32.mrf.mxu3 }
 0x234   : > { %595 = vrot.lane.b32.xlu0 %v582_v27, %s837_s22 }
 0x235   : > { %v579_v28 = vpop.f32.mrf.mxu1 }
 0x236   : > { %593 = vrot.lane.b32.xlu1 %v579_v28, %s837_s22 }
 0x23b   : > { %v584_v29 = vpop.f32.mrf.mxu3 }
 0x23c   : > { %597 = vrot.lane.b32.xlu2 %v584_v29, %s837_s22 }
 0x25a   : > { %v461_v38 = vpop.f32.mrf.mxu2 }
 0x260   : > { %v456_v31 = vpop.f32.mrf.mxu0 }
 0x262   : > { %v463_v40 = vpop.f32.mrf.mxu2 }
 0x268   : > { %v458_v44 = vpop.f32.mrf.mxu0 }
 0x288   : > { %v592_v32 = vpop.permute.xlu2 %591 }
 0x289   : > { %v604_v33 = vsel %vm603_vm1, %v456_v31, %v592_v32 }
 0x28a   : > { %vm609_vm2 = vcmp.ge.f32.partialorder %v604_v33, 0.0  ;;  %v616_v34 = vmul.f32 %v793_v30, %v604_v33 }
 0x28c   : > { %v620_v36 = vsel %vm609_vm2, %v604_v33, %v616_v34 }
 0x28d   : > { %v628_v37 = vadd.f32 %v624_v35, %v620_v36 }
 0x28f   : > { %633 = vst.msk [vmem:[%s980_s7] sm:$0xff] %vm632_vm3, %v628_v37 }
 0x296   : > { %v598_v39 = vpop.permute.xlu2 %597 }
 0x297   : > { %v607_v41 = vsel %vm603_vm1, %v463_v40, %v598_v39 }
 0x298   : > { %v619_v45 = vmul.f32 %v793_v30, %v607_v41  ;;  %vm612_vm5 = vcmp.ge.f32.partialorder %v607_v41, 0.0 }
 0x29a   : > { %v623_v53 = vsel %vm612_vm5, %v607_v41, %v619_v45 }
 0x29b   : > { %v631_v58 = vadd.f32 %v627_v54, %v623_v53 }
 0x29d   : > { %636 = vst.msk [vmem:[%s980_s7 + $0x18] sm:$0xff] %vm632_vm3, %v631_v58 }
 0x2a6   : > { %v596_v42 = vpop.permute.xlu0 %595 }
 0x2a7   : > { %v606_v43 = vsel %vm603_vm1, %v461_v38, %v596_v42 }
 0x2a8   : > { %vm611_vm4 = vcmp.ge.f32.partialorder %v606_v43, 0.0  ;;  %v618_v46 = vmul.f32 %v793_v30, %v606_v43  ;;  %v594_v47 = vpop.permute.xlu1 %593 }
 0x2a9   : > { %v605_v48 = vsel %vm603_vm1, %v458_v44, %v594_v47 }
 0x2aa   : > { %vm610_vm6 = vcmp.ge.f32.partialorder %v605_v48, 0.0  ;;  %v617_v49 = vmul.f32 %v793_v30, %v605_v48  ;;  %v622_v51 = vsel %vm611_vm4, %v606_v43, %v618_v46 }
 0x2ab   : > { %v630_v57 = vadd.f32 %v626_v52, %v622_v51 }
 0x2ac   : > { %v621_v55 = vsel %vm610_vm6, %v605_v48, %v617_v49 }
 0x2ad   : > { %v629_v56 = vadd.f32 %v625_v50, %v621_v55  ;;  %635 = vst.msk [vmem:[%s980_s7 + $0x10] sm:$0xff] %vm632_vm3, %v630_v57 }
 0x2af   : > { %634 = vst.msk [vmem:[%s980_s7 + $0x8] sm:$0xff] %vm632_vm3, %v629_v56 }
 0x2b0 PF: > { %s16_s21 = sadd.s32 1, %s832_s21  }
 0x2b1   : > { %p13_p4 = scmp.ge.s32.totalorder %s16_s21, 4  }
 0x2b3   :  { %15 = sbr.rel (!%p13_p4) target bundleno = 1 (0x1), region = 80 }

</bundles_post_ra>
